<compile_context>
chip_gen: v7x
topology: tpu7x:2x2x1
jax: 0.10.0
libtpu: 0.0.40
codegen_flags: <defaults>
</compile_context>

<pallas_src>
import functools

import jax
import jax.numpy as jnp
from jax.experimental import pallas as pl
from jax.experimental.pallas import tpu as pltpu

_BN_EPS = 1e-5


def _fc2_fc3_row(xs, action, w2s, b2, w2a, w3, b3):
    """relu(fc2([xs, action])) -> fc3, returned as a lane-dense (1, rows) row.

    * state half of fc2 (K = fc1) on the MXU in bf16 with f32 accumulation;
    * action half (K = action_size = 4) as statically unrolled VPU FMAs;
    * fc3 as w3 @ h^T on the MXU (M=1, K=fc2, N=rows): negligible extra MXU work
      and the result comes out lane-dense with no sublane->lane relayout.
    """
    h = jnp.dot(xs.astype(jnp.bfloat16), w2s,
                preferred_element_type=jnp.float32) + b2
    for k in range(action.shape[1]):                     # action_size is tiny & static
        h = h + action[:, k:k + 1] * w2a[k:k + 1, :]
    h = jnp.maximum(h, 0.0)
    q = jax.lax.dot_general(w3.astype(jnp.bfloat16), h.astype(jnp.bfloat16),
                            (((1,), (1,)), ((), ())),
                            preferred_element_type=jnp.float32)
    return q + b3                                        # (1, rows)


# ----------------------------------------------------------------------------
# Fused single-call path: whole batch resident in VMEM (small/medium B).
# ----------------------------------------------------------------------------
def _critic_fused_kernel(state_ref, action_ref, w1_ref, b1_ref, gamma_ref,
                         beta_ref, w2s_ref, w2a_ref, b2_ref, w3_ref, b3_ref,
                         out_ref):
    xs = jnp.dot(state_ref[...].astype(jnp.bfloat16), w1_ref[...],
                 preferred_element_type=jnp.float32) + b1_ref[...]
    xs = jnp.maximum(xs, 0.0)
    # Training-mode BatchNorm1d over the full resident batch (centered two-pass
    # variance: numerically safer than E[x^2] - mean^2).
    mean = jnp.mean(xs, axis=0, keepdims=True)
    d = xs - mean
    var = jnp.mean(d * d, axis=0, keepdims=True)
    xs = d * (gamma_ref[...] * jax.lax.rsqrt(var + _BN_EPS)) + beta_ref[...]
    out_ref[...] = _fc2_fc3_row(xs, action_ref[...], w2s_ref[...], b2_ref[...],
                                w2a_ref[...], w3_ref[...], b3_ref[...])


# ----------------------------------------------------------------------------
# Two-pass batch-gridded path (large B).
# ----------------------------------------------------------------------------
def _fc1_stats_kernel(state_ref, w1_ref, b1_ref, stats_ref, *, block_b, b_real,
                      need_mask):
    """Pass 1: xs = relu(fc1(state)) for this batch block; emit partial BN stats.

    Stats block layout (8, fc1): row 0 = sum(xs), row 1 = sum(xs*xs), rows 2..7 = 0.
    Padded batch rows (global index >= b_real) are masked out so the full-batch
    statistics stay exact.
    """
    xs = jnp.dot(state_ref[...].astype(jnp.bfloat16), w1_ref[...],
                 preferred_element_type=jnp.float32) + b1_ref[...]
    xs = jnp.maximum(xs, 0.0)
    if need_mask:
        gidx = (pl.program_id(0) * block_b
                + jax.lax.broadcasted_iota(jnp.int32, xs.shape, 0))
        xs = jnp.where(gidx < b_real, xs, 0.0)
    n = xs.shape[1]
    s1 = jnp.broadcast_to(jnp.sum(xs, axis=0, keepdims=True), (8, n))
    s2 = jnp.broadcast_to(jnp.sum(xs * xs, axis=0, keepdims=True), (8, n))
    row = jax.lax.broadcasted_iota(jnp.int32, (8, n), 0)
    stats_ref[...] = jnp.where(row == 0, s1, jnp.where(row == 1, s2, 0.0))


def _critic_block_kernel(state_ref, action_ref, w1_ref, b1_ref, w2s_ref,
                         w2a_ref, b2_ref, w3_ref, b3_ref, out_ref):
    """Pass 2: fc1 -> (BN folded into fc2) -> fc2 -> fc3 for one batch block."""
    # fc1 + relu recomputed here: cheaper than round-tripping the (B, fc1)
    # intermediate through HBM on v5e/v6e (on v7x an HBM staging would be ~neutral).
    xs = jnp.dot(state_ref[...].astype(jnp.bfloat16), w1_ref[...],
                 preferred_element_type=jnp.float32) + b1_ref[...]
    xs = jnp.maximum(xs, 0.0)
    # BatchNorm scale/shift are already folded into w2s_ref / b2_ref (wrapper glue).
    row = _fc2_fc3_row(xs, action_ref[...], w2s_ref[...], b2_ref[...],
                       w2a_ref[...], w3_ref[...], b3_ref[...])   # (1, block_b)
    out_ref[...] = row[None]                                      # (1, 1, block_b)


def _pick_batch_block(B, target=2048):
    """Batch tiling for the two-pass path.

    Always produces >= 2 blocks (so dimension_semantics=('parallel',) can use both
    TensorCores on v7x), blocks that are multiples of 8 (sublane alignment) and a
    padded batch b_pad = nblk * block_b >= B (padded rows are masked out of the
    BatchNorm statistics and sliced off the output).
    """
    nblk = max(2, -(-B // target))
    block = -(-B // nblk)
    block = max(8, ((block + 7) // 8) * 8)
    return block, nblk * block


def critic_forward(state, action, params, *, block_b=None, fused_max_b=1024):
    """Forward pass of `Critic` (training-mode BatchNorm, exact full-batch stats)."""
    if state.ndim == 1:
        state = state[None, :]
    if action.ndim == 1:
        action = action[None, :]
    state = state.astype(jnp.float32)
    action = action.astype(jnp.float32)

    B, state_size = state.shape
    action_size = action.shape[1]
    fc1 = params["w1"].shape[1]
    fc2 = params["w2s"].shape[1]

    w1 = params["w1"].astype(jnp.bfloat16)

    # ---- Fused single-call fast path: all activations fit comfortably in VMEM.
    if block_b is None and B <= fused_max_b:
        row = pl.pallas_call(
            _critic_fused_kernel,
            out_shape=jax.ShapeDtypeStruct((1, B), jnp.float32),
        )(state, action, w1, params["b1"], params["gamma"], params["beta"],
          params["w2s"].astype(jnp.bfloat16), params["w2a"], params["b2"],
          params["w3r"], params["b3"])
        return row.reshape(B, 1)

    # ---- Two-pass batch-gridded path.
    if block_b is None:
        block_b, b_pad = _pick_batch_block(B)
    else:
        block_b = max(8, ((int(block_b) + 7) // 8) * 8)
        b_pad = -(-B // block_b) * block_b
    nblk = b_pad // block_b
    need_mask = b_pad != B
    if need_mask:
        state = jnp.pad(state, ((0, b_pad - B), (0, 0)))
        action = jnp.pad(action, ((0, b_pad - B), (0, 0)))

    cparams = pltpu.CompilerParams(
        dimension_semantics=("parallel",),
        vmem_limit_bytes=32 * 1024 * 1024,   # explicit; above v5e's 16 MiB scoped default
    )

    # Pass 1: per-block partial sums / sums-of-squares of relu(fc1(state)) so the
    # full-batch BatchNorm statistics stay exact regardless of batch tiling.
    stats = pl.pallas_call(
        functools.partial(_fc1_stats_kernel, block_b=block_b, b_real=B,
                          need_mask=need_mask),
        out_shape=jax.ShapeDtypeStruct((8 * nblk, fc1), jnp.float32),
        grid=(nblk,),
        in_specs=[
            pl.BlockSpec((block_b, state_size), lambda i: (i, 0)),
            pl.BlockSpec((state_size, fc1), lambda i: (0, 0)),   # resident weights
            pl.BlockSpec((1, fc1), lambda i: (0, 0)),
        ],
        out_specs=pl.BlockSpec((8, fc1), lambda i: (i, 0)),
        compiler_params=cparams,
    )(state, w1, params["b1"])

    # Tiny glue: combine partial stats and fold BatchNorm into fc2 (scale into
    # the weights, shift into the bias).  Exact: BN feeds fc2 linearly.
    tot = stats.reshape(nblk, 8, fc1).sum(axis=0)
    mean = tot[0] / B
    var = jnp.maximum(tot[1] / B - mean * mean, 0.0)     # biased var (training BN)
    scale = params["gamma"][0] * jax.lax.rsqrt(var + _BN_EPS)
    shift = params["beta"][0] - mean * scale
    w2s_eff = (scale[:, None] * params["w2s"]).astype(jnp.bfloat16)
    b2_eff = params["b2"] + shift[None, :] @ params["w2s"]

    # Pass 2: fc1 -> (folded BN) -> fc2 -> fc3, lane-dense (1, 1, block_b) output.
    out = pl.pallas_call(
        _critic_block_kernel,
        out_shape=jax.ShapeDtypeStruct((nblk, 1, block_b), jnp.float32),
        grid=(nblk,),
        in_specs=[
            pl.BlockSpec((block_b, state_size), lambda i: (i, 0)),
            pl.BlockSpec((block_b, action_size), lambda i: (i, 0)),
            pl.BlockSpec((state_size, fc1), lambda i: (0, 0)),
            pl.BlockSpec((1, fc1), lambda i: (0, 0)),
            pl.BlockSpec((fc1, fc2), lambda i: (0, 0)),
            pl.BlockSpec((action_size, fc2), lambda i: (0, 0)),
            pl.BlockSpec((1, fc2), lambda i: (0, 0)),
            pl.BlockSpec((1, fc2), lambda i: (0, 0)),
            pl.BlockSpec((1, 1), lambda i: (0, 0)),
        ],
        out_specs=pl.BlockSpec((1, 1, block_b), lambda i: (i, 0, 0)),
        compiler_params=cparams,
    )(state, action, w1, params["b1"], w2s_eff, params["w2a"], b2_eff,
      params["w3r"], params["b3"])
    return out.reshape(b_pad, 1)[:B]


def critic_reference(state, action, params, eps=_BN_EPS):
    """Pure-JAX f32 reference of the PyTorch forward (training-mode BN)."""
    xs = jnp.maximum(state @ params["w1"] + params["b1"], 0.0)
    mean = jnp.mean(xs, axis=0, keepdims=True)
    var = jnp.mean((xs - mean) ** 2, axis=0, keepdims=True)
    xs = (xs - mean) * jax.lax.rsqrt(var + eps) * params["gamma"] + params["beta"]
    h = jnp.maximum(xs @ params["w2s"] + action @ params["w2a"] + params["b2"], 0.0)
    return h @ params["w3r"].T + params["b3"]


def init_params(key, state_size, action_size, fc1_units=256, fc2_units=128):
    """Shapes (and uniform ranges) mirroring Critic.__init__ / reset_parameters."""
    ks = jax.random.split(key, 6)
    lim1 = 1.0 / jnp.sqrt(jnp.float32(fc1_units))        # hidden_init: weight.size()[0]
    lim2 = 1.0 / jnp.sqrt(jnp.float32(fc2_units))
    w1 = jax.random.uniform(ks[0], (state_size, fc1_units), jnp.float32, -lim1, lim1)
    b1 = jax.random.uniform(ks[1], (1, fc1_units), jnp.float32,
                            -1.0 / jnp.sqrt(jnp.float32(state_size)),
                            1.0 / jnp.sqrt(jnp.float32(state_size)))
    w2 = jax.random.uniform(ks[2], (fc1_units + action_size, fc2_units),
                            jnp.float32, -lim2, lim2)
    b2 = jax.random.uniform(ks[3], (1, fc2_units), jnp.float32,
                            -1.0 / jnp.sqrt(jnp.float32(fc1_units + action_size)),
                            1.0 / jnp.sqrt(jnp.float32(fc1_units + action_size)))
    w3r = jax.random.uniform(ks[4], (1, fc2_units), jnp.float32, -3e-3, 3e-3)
    b3 = jax.random.uniform(ks[5], (1, 1), jnp.float32,
                            -1.0 / jnp.sqrt(jnp.float32(fc2_units)),
                            1.0 / jnp.sqrt(jnp.float32(fc2_units)))
    return {
        "w1": w1, "b1": b1,
        "gamma": jnp.ones((1, fc1_units), jnp.float32),   # bn1.weight
        "beta": jnp.zeros((1, fc1_units), jnp.float32),   # bn1.bias
        "w2s": w2[:fc1_units, :], "w2a": w2[fc1_units:, :], "b2": b2,
        "w3r": w3r, "b3": b3,
    }


if __name__ == "__main__":
    STATE, ACTION = 32, 4
    FC1, FC2 = 256, 128

    key = jax.random.PRNGKey(0)
    k_state, k_action, k_params, k_state2, k_action2 = jax.random.split(key, 5)
    params = init_params(k_params, STATE, ACTION, FC1, FC2)

    critic = jax.jit(critic_forward)

    # Small batch -> fused single-call path.
    B = 32
    state = jax.random.normal(k_state, (B, STATE), jnp.float32)
    action = jax.random.normal(k_action, (B, ACTION), jnp.float32)
    out = critic(state, action, params)
    jax.block_until_ready(out)
    assert out.shape == (B, 1)
    assert bool(jnp.all(jnp.isfinite(out)))
    ref = critic_reference(state, action, params)
    # Loose tolerance: kernel uses bf16 weights/activations with f32 accumulation.
    assert bool(jnp.allclose(out, ref, rtol=1e-1, atol=1e-2)), (
        "fused path max abs diff %g" % float(jnp.max(jnp.abs(out - ref))))

    # Larger, odd batch -> two-pass gridded path (2 parallel blocks, padded batch,
    # masked BN statistics, lane-dense output).
    B2 = 1037
    state2 = jax.random.normal(k_state2, (B2, STATE), jnp.float32)
    action2 = jax.random.normal(k_action2, (B2, ACTION), jnp.float32)
    out2 = critic(state2, action2, params)
    jax.block_until_ready(out2)
    assert out2.shape == (B2, 1)
    assert bool(jnp.all(jnp.isfinite(out2)))
    ref2 = critic_reference(state2, action2, params)
    assert bool(jnp.allclose(out2, ref2, rtol=1e-1, atol=1e-2)), (
        "two-pass path max abs diff %g" % float(jnp.max(jnp.abs(out2 - ref2))))

    print("KERNEL_OK")
</pallas_src>

<mosaic_0001>
module attributes {stable_mosaic.version = 11 : i64} {
  func.func @_critic_fused_kernel(%arg0: memref<32x32xf32, #tpu.memory_space<vmem>>, %arg1: memref<32x4xf32, #tpu.memory_space<vmem>>, %arg2: memref<32x256xbf16, #tpu.memory_space<vmem>>, %arg3: memref<1x256xf32, #tpu.memory_space<vmem>>, %arg4: memref<1x256xf32, #tpu.memory_space<vmem>>, %arg5: memref<1x256xf32, #tpu.memory_space<vmem>>, %arg6: memref<256x128xbf16, #tpu.memory_space<vmem>>, %arg7: memref<4x128xf32, #tpu.memory_space<vmem>>, %arg8: memref<1x128xf32, #tpu.memory_space<vmem>>, %arg9: memref<1x128xf32, #tpu.memory_space<vmem>>, %arg10: memref<1x1xf32, #tpu.memory_space<vmem>>, %arg11: memref<1x32xf32, #tpu.memory_space<vmem>>) attributes {dimension_semantics = [], scalar_prefetch = 0 : i64, scratch_operands = 0 : i64, tpu.core_type = #tpu.core_type<tc>} {
    %c0 = arith.constant 0 : index
    %c0_0 = arith.constant 0 : index
    %0 = vector.load %arg0[%c0, %c0_0] : memref<32x32xf32, #tpu.memory_space<vmem>>, vector<32x32xf32>
    %1 = arith.truncf %0 : vector<32x32xf32> to vector<32x32xbf16>
    %c0_1 = arith.constant 0 : index
    %c0_2 = arith.constant 0 : index
    %2 = vector.load %arg2[%c0_1, %c0_2] : memref<32x256xbf16, #tpu.memory_space<vmem>>, vector<32x256xbf16>
    %cst = arith.constant dense<0.000000e+00> : vector<32x256xf32>
    %3 = tpu.matmul %1, %2, %cst {dimension_numbers = #tpu.dot_dimension_numbers<[1], [0], [0], [1], [0, 0, 1, 1], [], []>} : vector<32x32xbf16>, vector<32x256xbf16>, vector<32x256xf32> -> vector<32x256xf32>
    %c0_3 = arith.constant 0 : index
    %c0_4 = arith.constant 0 : index
    %4 = vector.load %arg3[%c0_3, %c0_4] : memref<1x256xf32, #tpu.memory_space<vmem>>, vector<1x256xf32>
    %5 = vector.broadcast %4 : vector<1x256xf32> to vector<32x256xf32>
    %6 = arith.addf %3, %5 : vector<32x256xf32>
    %cst_5 = arith.constant 0.000000e+00 : f32
    %7 = vector.broadcast %cst_5 : f32 to vector<32x256xf32>
    %8 = arith.maximumf %6, %7 : vector<32x256xf32>
    %cst_6 = arith.constant dense<0.000000e+00> : vector<256xf32>
    %9 = vector.multi_reduction <add>, %8, %cst_6 [0] : vector<32x256xf32> to vector<256xf32>
    %10 = vector.shape_cast %9 : vector<256xf32> to vector<1x256xf32>
    %cst_7 = arith.constant 3.200000e+01 : f32
    %11 = vector.broadcast %cst_7 : f32 to vector<1x256xf32>
    %12 = arith.divf %10, %11 : vector<1x256xf32>
    %13 = vector.broadcast %12 : vector<1x256xf32> to vector<32x256xf32>
    %14 = arith.subf %8, %13 : vector<32x256xf32>
    %15 = arith.mulf %14, %14 : vector<32x256xf32>
    %cst_8 = arith.constant dense<0.000000e+00> : vector<256xf32>
    %16 = vector.multi_reduction <add>, %15, %cst_8 [0] : vector<32x256xf32> to vector<256xf32>
    %17 = vector.shape_cast %16 : vector<256xf32> to vector<1x256xf32>
    %cst_9 = arith.constant 3.200000e+01 : f32
    %18 = vector.broadcast %cst_9 : f32 to vector<1x256xf32>
    %19 = arith.divf %17, %18 : vector<1x256xf32>
    %c0_10 = arith.constant 0 : index
    %c0_11 = arith.constant 0 : index
    %20 = vector.load %arg4[%c0_10, %c0_11] : memref<1x256xf32, #tpu.memory_space<vmem>>, vector<1x256xf32>
    %cst_12 = arith.constant 9.99999974E-6 : f32
    %21 = vector.broadcast %cst_12 : f32 to vector<1x256xf32>
    %22 = arith.addf %19, %21 : vector<1x256xf32>
    %23 = math.rsqrt %22 : vector<1x256xf32>
    %24 = arith.mulf %20, %23 : vector<1x256xf32>
    %25 = vector.broadcast %24 : vector<1x256xf32> to vector<32x256xf32>
    %26 = arith.mulf %14, %25 : vector<32x256xf32>
    %c0_13 = arith.constant 0 : index
    %c0_14 = arith.constant 0 : index
    %27 = vector.load %arg5[%c0_13, %c0_14] : memref<1x256xf32, #tpu.memory_space<vmem>>, vector<1x256xf32>
    %28 = vector.broadcast %27 : vector<1x256xf32> to vector<32x256xf32>
    %29 = arith.addf %26, %28 : vector<32x256xf32>
    %c0_15 = arith.constant 0 : index
    %c0_16 = arith.constant 0 : index
    %30 = vector.load %arg1[%c0_15, %c0_16] : memref<32x4xf32, #tpu.memory_space<vmem>>, vector<32x4xf32>
    %c0_17 = arith.constant 0 : index
    %c0_18 = arith.constant 0 : index
    %31 = vector.load %arg6[%c0_17, %c0_18] : memref<256x128xbf16, #tpu.memory_space<vmem>>, vector<256x128xbf16>
    %c0_19 = arith.constant 0 : index
    %c0_20 = arith.constant 0 : index
    %32 = vector.load %arg8[%c0_19, %c0_20] : memref<1x128xf32, #tpu.memory_space<vmem>>, vector<1x128xf32>
    %c0_21 = arith.constant 0 : index
    %c0_22 = arith.constant 0 : index
    %33 = vector.load %arg7[%c0_21, %c0_22] : memref<4x128xf32, #tpu.memory_space<vmem>>, vector<4x128xf32>
    %c0_23 = arith.constant 0 : index
    %c0_24 = arith.constant 0 : index
    %34 = vector.load %arg9[%c0_23, %c0_24] : memref<1x128xf32, #tpu.memory_space<vmem>>, vector<1x128xf32>
    %c0_25 = arith.constant 0 : index
    %c0_26 = arith.constant 0 : index
    %35 = vector.load %arg10[%c0_25, %c0_26] : memref<1x1xf32, #tpu.memory_space<vmem>>, vector<1x1xf32>
    %36 = arith.truncf %29 : vector<32x256xf32> to vector<32x256xbf16>
    %cst_27 = arith.constant dense<0.000000e+00> : vector<32x128xf32>
    %37 = tpu.matmul %36, %31, %cst_27 {dimension_numbers = #tpu.dot_dimension_numbers<[1], [0], [0], [1], [0, 0, 1, 1], [], []>} : vector<32x256xbf16>, vector<256x128xbf16>, vector<32x128xf32> -> vector<32x128xf32>
    %38 = vector.broadcast %32 : vector<1x128xf32> to vector<32x128xf32>
    %39 = arith.addf %37, %38 : vector<32x128xf32>
    %40 = vector.extract_strided_slice %30 {offsets = [0, 0], sizes = [32, 1], strides = [1, 1]} : vector<32x4xf32> to vector<32x1xf32>
    %41 = vector.extract_strided_slice %33 {offsets = [0, 0], sizes = [1, 128], strides = [1, 1]} : vector<4x128xf32> to vector<1x128xf32>
    %42 = vector.broadcast %40 : vector<32x1xf32> to vector<32x128xf32>
    %43 = vector.broadcast %41 : vector<1x128xf32> to vector<32x128xf32>
    %44 = arith.mulf %42, %43 : vector<32x128xf32>
    %45 = arith.addf %39, %44 : vector<32x128xf32>
    %46 = vector.extract_strided_slice %30 {offsets = [0, 1], sizes = [32, 1], strides = [1, 1]} : vector<32x4xf32> to vector<32x1xf32>
    %47 = vector.extract_strided_slice %33 {offsets = [1, 0], sizes = [1, 128], strides = [1, 1]} : vector<4x128xf32> to vector<1x128xf32>
    %48 = vector.broadcast %46 : vector<32x1xf32> to vector<32x128xf32>
    %49 = vector.broadcast %47 : vector<1x128xf32> to vector<32x128xf32>
    %50 = arith.mulf %48, %49 : vector<32x128xf32>
    %51 = arith.addf %45, %50 : vector<32x128xf32>
    %52 = vector.extract_strided_slice %30 {offsets = [0, 2], sizes = [32, 1], strides = [1, 1]} : vector<32x4xf32> to vector<32x1xf32>
    %53 = vector.extract_strided_slice %33 {offsets = [2, 0], sizes = [1, 128], strides = [1, 1]} : vector<4x128xf32> to vector<1x128xf32>
    %54 = vector.broadcast %52 : vector<32x1xf32> to vector<32x128xf32>
    %55 = vector.broadcast %53 : vector<1x128xf32> to vector<32x128xf32>
    %56 = arith.mulf %54, %55 : vector<32x128xf32>
    %57 = arith.addf %51, %56 : vector<32x128xf32>
    %58 = vector.extract_strided_slice %30 {offsets = [0, 3], sizes = [32, 1], strides = [1, 1]} : vector<32x4xf32> to vector<32x1xf32>
    %59 = vector.extract_strided_slice %33 {offsets = [3, 0], sizes = [1, 128], strides = [1, 1]} : vector<4x128xf32> to vector<1x128xf32>
    %60 = vector.broadcast %58 : vector<32x1xf32> to vector<32x128xf32>
    %61 = vector.broadcast %59 : vector<1x128xf32> to vector<32x128xf32>
    %62 = arith.mulf %60, %61 : vector<32x128xf32>
    %63 = arith.addf %57, %62 : vector<32x128xf32>
    %cst_28 = arith.constant 0.000000e+00 : f32
    %64 = vector.broadcast %cst_28 : f32 to vector<32x128xf32>
    %65 = arith.maximumf %63, %64 : vector<32x128xf32>
    %66 = arith.truncf %34 : vector<1x128xf32> to vector<1x128xbf16>
    %67 = arith.truncf %65 : vector<32x128xf32> to vector<32x128xbf16>
    %cst_29 = arith.constant dense<0.000000e+00> : vector<1x32xf32>
    %68 = tpu.matmul %66, %67, %cst_29 {dimension_numbers = #tpu.dot_dimension_numbers<[1], [1], [0], [0], [0, 0, 1, 0], [], []>} : vector<1x128xbf16>, vector<32x128xbf16>, vector<1x32xf32> -> vector<1x32xf32>
    %69 = vector.broadcast %35 : vector<1x1xf32> to vector<1x32xf32>
    %70 = arith.addf %68, %69 : vector<1x32xf32>
    %c0_30 = arith.constant 0 : index
    %c0_31 = arith.constant 0 : index
    %71 = vector.load %arg11[%c0_30, %c0_31] : memref<1x32xf32, #tpu.memory_space<vmem>>, vector<1x32xf32>
    tpu.vector_store %arg11[%c0_30, %c0_31], %70 {strides = array<i32>} : memref<1x32xf32, #tpu.memory_space<vmem>>, vector<1x32xf32>,
    return
  }
}

</mosaic_0001>

<bundles_post_ra>
// kernel: critic_forward.1
= control target key start
LH: loop header
LB: loop body
LE: loop exit
PB: predicated region body
PF: predicated region fallthrough
CT: control target
= control target key end

     0   :  { %s1001_s0 = inlined_call_operand.vmem [shape: f32[32,32], index: 0, kind: input, shape index: {}]   ;;  %s1002_s1 = inlined_call_operand.vmem [shape: f32[32,4], index: 1, kind: input, shape index: {}]   ;;  %s1003_s2 = inlined_call_operand.vmem [shape: bf16[32,256], index: 2, kind: input, shape index: {}]   ;;  %s1004_s3 = inlined_call_operand.vmem [shape: f32[1,256], index: 3, kind: input, shape index: {}]   ;;  %s1005_s4 = inlined_call_operand.vmem [shape: f32[1,256], index: 4, kind: input, shape index: {}]   ;;  %s1006_s5 = inlined_call_operand.vmem [shape: f32[1,256], index: 5, kind: input, shape index: {}]   ;;  %s1007_s6 = inlined_call_operand.vmem [shape: bf16[256,128], index: 6, kind: input, shape index: {}]   ;;  %s1008_s7 = inlined_call_operand.vmem [shape: f32[4,128], index: 7, kind: input, shape index: {}]   ;;  %s1009_s8 = inlined_call_operand.vmem [shape: f32[1,128], index: 8, kind: input, shape index: {}]   ;;  %s1010_s9 = inlined_call_operand.vmem [shape: f32[1,128], index: 9, kind: input, shape index: {}]   ;;  %s1011_s10 = inlined_call_operand.<no memory space> [shape: f32[1,1], index: 10, kind: input, shape index: {}]   ;;  %s1012_s11 = inlined_call_operand.hbm [shape: f32[1,32], index: 11, kind: output, shape index: {}]  }
   0x1   :  { %v16_v0 = vstv %s1011_s10 }
   0x2   :  { %17 = vst [vmem:[#allocation2] sm:$0x1] %v16_v0 }
   0x3   :  { %v738_v1 = vld [vmem:[%s1003_s2 + $0x4] ss:$8 sps:$4 sm:$0xff]   ;;  %v740_v2 = vld [vmem:[%s1003_s2] ss:$8 sps:$4 sm:$0xff]   ;;  %v788_v3 = vmov 0   ;;  %vm84_vm0 = vcmask 261120  }
   0x4   :  { %123 = vmatprep.mubr.bf16.mxu0 %v788_v3  ;;  %725 = vset.pattern.permute.xlu0 %v788_v3  ;;  %v741_v4 = vld [vmem:[%s1003_s2 + $0x14] ss:$8 sps:$4 sm:$0xff]   ;;  %v743_v5 = vld [vmem:[%s1003_s2 + $0x10] ss:$8 sps:$4 sm:$0xff]   ;;  %v42_v6 = vld [vmem:[%s1001_s0] sm:$0xff] }
   0x5   :  { %91 = vmatprep.subr.bf16.mxu0 %v738_v1  ;;  %v43_v7 = vld [vmem:[%s1001_s0 + $0x8] sm:$0xff]  ;;  %v44_v9 = vld [vmem:[%s1001_s0 + $0x10] sm:$0xff]  ;;  %v45_v10 = vld [vmem:[%s1001_s0 + $0x18] sm:$0xff] }
   0x6   :  { %92 = vmatpush1.bf16.msra.mxu0 %v740_v2  ;;  %v46_v8 = vpack.c.bf16 %v43_v7, %v42_v6  ;;  %v47_v11 = vpack.c.bf16 %v45_v10, %v44_v9 }
   0x7   :  { %93 = vmatprep.subr.bf16.mxu0 %v741_v4 }
   0xa   :  { %94 = vmatpush1.bf16.msra.mxu0 %v743_v5 }
   0xd   :  { %659 = vmatmul.mubr.msk.bf16.vlgmr.msra.gmra.mrb[0].mxu0 %vm84_vm0, %v46_v8 }
   0xe   :  { %133 = vmatprep.mubr.bf16.mxu0 %v788_v3 }
   0xf   :  { %18 = vsyncpa [#allocation4], 0  ;;  %v744_v12 = vld [vmem:[%s1007_s6 + $0x40] sm:$0xff]   ;;  %v746_v14 = vld [vmem:[%s1007_s6 + $0x48] sm:$0xff]   ;;  %v789_v29 = vmov 1   ;;  %v790_v31 = vmov 2   ;;  %v54_v34 = vlaneseq }
  0x10   :  { %v745_v13 = vld [vmem:[%s1007_s6] sm:$0xff]   ;;  %678 = vmatprep.subr.bf16.mxu1 %v744_v12  ;;  %v747_v15 = vld [vmem:[%s1007_s6 + $0x8] sm:$0xff]   ;;  %v748_v16 = vld [vmem:[%s1007_s6 + $0x50] sm:$0xff]   ;;  %726 = vset.pattern.permute.xlu1 %v789_v29  ;;  %v791_v32 = vmov 3   ;;  %vm794_vm1 = vmmov 0   ;;  %s795_s15 = smov [#allocation3]  }
  0x11   :  { %679 = vmatpush3.bf16.msra.mxu1 %v745_v13  ;;  %v749_v17 = vld [vmem:[%s1007_s6 + $0x10] sm:$0xff]   ;;  %v750_v18 = vld [vmem:[%s1007_s6 + $0x58] sm:$0xff]   ;;  %v752_v20 = vld [vmem:[%s1007_s6 + $0x60] sm:$0xff]   ;;  %v947_v36 = vshrl.u32 %v54_v34, 7  ;;  %s647_s16 = sshll.u32 %s795_s15, 4  ;;  %vm639_vm2 = vcmask 253952   ;;  %s648_s16 = int_to_ptr.vmem [resolvable:$true] %s647_s16 }
  0x12   :  { %680 = vmatprep.subr.bf16.mxu1 %v746_v14  ;;  %v751_v19 = vld [vmem:[%s1007_s6 + $0x18] sm:$0xff]   ;;  %v753_v21 = vld [vmem:[%s1007_s6 + $0x20] sm:$0xff]   ;;  %v754_v22 = vld [vmem:[%s1007_s6 + $0x68] sm:$0xff]   ;;  %s764_s17 = scalar_lea.vmem %s648_s16, 16  ;;  %s768_s18 = scalar_lea.vmem %s648_s16, 32 }
  0x13   :  { %v755_v23 = vld [vmem:[%s1007_s6 + $0x28] sm:$0xff]   ;;  %v756_v24 = vld [vmem:[%s1007_s6 + $0x70] sm:$0xff]   ;;  %v758_v26 = vld [vmem:[%s1007_s6 + $0x78] sm:$0xff]   ;;  %v950_v37 = vsub.s32 0, %v947_v36  ;;  %v956_v39 = vsub.s32 1, %v947_v36  ;;  %p765_p0 = scmp.ne.s32.totalorder %s648_s16, %s764_s17  ;;  %p769_p1 = scmp.lt.s32.totalorder %s648_s16, %s648_s16 }
  0x14   :  { %v757_v25 = vld [vmem:[%s1007_s6 + $0x30] sm:$0xff]   ;;  %v759_v27 = vld [vmem:[%s1007_s6 + $0x38] sm:$0xff]   ;;  %v272_v28 = vld [vmem:[%s1002_s1] sm:$0xff]  ;;  %p770_p2 = scmp.lt.s32.totalorder %s768_s18, %s764_s17 }
  0x15   :  { %660 = vmatmul.mubr.msk.bf16.gmra.mrb[4].mxu0 %vm84_vm0, %v47_v11  ;;  %681 = vmatpush3.bf16.msra.mxu1 %v747_v15  ;;  %v273_v30 = vld [vmem:[%s1002_s1 + $0x8] sm:$0xff]  ;;  %v274_v33 = vld [vmem:[%s1002_s1 + $0x10] sm:$0xff]  ;;  %v275_v35 = vld [vmem:[%s1002_s1 + $0x18] sm:$0xff] }
  0x16   :  { %682 = vmatprep.subr.bf16.mxu1 %v748_v16  ;;  %469 = vperm.xlu0 %725, %v272_v28   ;;  %v52_v38 = vld [vmem:[%s1004_s3] sm:$0x3]  ;;  %p771_p3 = por %p770_p2, %p769_p1 }
  0x17   :  { %500 = vperm.xlu1 %726, %v272_v28   ;;  %v57_v40 = vrot.slane %v52_v38, %v950_v37  ;;  %v61_v41 = vrot.slane %v52_v38, %v956_v39 }
  0x18   :  { %p772_p4 = pnand %p771_p3, %p765_p0 }
  0x19   :  { %683 = vmatpush3.bf16.msra.mxu1 %v749_v17 }
  0x1a   :  { %684 = vmatprep.subr.bf16.mxu1 %v750_v18  ;;  %474 = vperm.xlu0 %725, %v273_v30  }
  0x1b   :  { %504 = vperm.xlu1 %726, %v273_v30  }
  0x1d   :  { %685 = vmatpush3.bf16.msra.mxu1 %v751_v19 }
  0x1e   :  { %686 = vmatprep.subr.bf16.mxu1 %v752_v20  ;;  %727 = vset.pattern.permute.xlu0 %v790_v31 }
  0x1f   :  { %728 = vset.pattern.permute.xlu1 %v790_v31  ;;  %528 = vperm.xlu0 %727, %v272_v28  }
  0x20   :  { %532 = vperm.xlu1 %728, %v273_v30  }
  0x21   :  { %687 = vmatpush3.bf16.msra.mxu1 %v753_v21 }
  0x22   :  { %688 = vmatprep.subr.bf16.mxu1 %v754_v22 }
  0x23   :  { %730 = vset.pattern.permute.xlu0 %v791_v32 }
  0x24   :  { %729 = vset.pattern.permute.xlu1 %v791_v32  ;;  %560 = vperm.xlu0 %730, %v273_v30  }
  0x25   :  { %689 = vmatpush3.bf16.msra.mxu1 %v755_v23  ;;  %556 = vperm.xlu1 %729, %v272_v28  }
  0x26   :  { %690 = vmatprep.subr.bf16.mxu1 %v756_v24 }
  0x28   :  { %732 = vset.pattern.permute.xlu0 %v789_v29 }
  0x29   :  { %691 = vmatpush3.bf16.msra.mxu1 %v757_v25  ;;  %731 = vset.pattern.permute.xlu1 %v788_v3 }
  0x2a   :  { %692 = vmatprep.subr.bf16.mxu1 %v758_v26  ;;  %508 = vperm.xlu0 %732, %v274_v33  }
  0x2b   :  { %479 = vperm.xlu1 %731, %v274_v33  }
  0x2d   :  { %693 = vmatpush3.bf16.msra.mxu1 %v759_v27 }
  0x2e   :  { %735 = vset.pattern.permute.xlu0 %v790_v31 }
  0x2f   :  { %484 = vperm.xlu1 %731, %v275_v35   ;;  %540 = vperm.xlu0 %735, %v275_v35  }
  0x33   :  { %733 = vset.pattern.permute.xlu1 %v789_v29  ;;  %737 = vset.pattern.permute.xlu0 %v788_v3 }
  0x34   :  { %512 = vperm.xlu1 %733, %v275_v35  }
  0x38   :  { %734 = vset.pattern.permute.xlu1 %v790_v31 }
  0x39   :  { %536 = vperm.xlu1 %734, %v274_v33  }
  0x3d   :  { %736 = vset.pattern.permute.xlu1 %v791_v32 }
  0x3e   :  { %564 = vperm.xlu1 %736, %v274_v33  }
  0x42   :  { %568 = vperm.xlu1 %736, %v275_v35  }
  0xe0   :  { %v125_v42 = vpop.f32.mrb[0].mxu0 }
  0xe1   :  { %v126_v43 = vadd.f32 %v125_v42, %v57_v40  ;;  %v127_v44 = vpop.f32.mrb[1].mxu0 }
  0xe2   :  { %v128_v45 = vadd.f32 %v127_v44, %v61_v41  ;;  %v129_v46 = vpop.f32.mrb[2].mxu0 }
  0xe3   :  { %v130_v47 = vadd.f32 %v129_v46, %v57_v40  ;;  %v131_v48 = vpop.f32.mrb[3].mxu0  ;;  %v144_v50 = vmax.f32 %v126_v43, 0.0 }
  0xe4   :  { %v132_v49 = vadd.f32 %v131_v48, %v61_v41  ;;  %v145_v52 = vmax.f32 %v128_v45, 0.0 }
  0xe5   :  { %v146_v51 = vmax.f32 %v130_v47, 0.0 }
  0xe6   :  { %v147_v53 = vmax.f32 %v132_v49, 0.0 }
  0xe7   :  { %v152_v54 = vadd.f32 %v146_v51, %v144_v50 }
  0xe8   :  { %v161_v55 = vadd.f32 %v147_v53, %v145_v52  ;;  %v135_v56 = vpop.f32.mrb[4].mxu0 }
  0xe9   :  { %v136_v57 = vadd.f32 %v135_v56, %v57_v40  ;;  %v137_v58 = vpop.f32.mrb[5].mxu0 }
  0xea   :  { %v138_v59 = vadd.f32 %v137_v58, %v61_v41  ;;  %v139_v60 = vpop.f32.mrb[6].mxu0 }
  0xeb   :  { %v148_v61 = vmax.f32 %v136_v57, 0.0  ;;  %v140_v62 = vadd.f32 %v139_v60, %v57_v40  ;;  %v141_v63 = vpop.f32.mrb[7].mxu0 }
  0xec   :  { %v149_v0 = vmax.f32 %v138_v59, 0.0  ;;  %v142_v1 = vadd.f32 %v141_v63, %v61_v41  ;;  %v792_v63 = vmov 1966171168  }
  0xed   :  { %v153_v2 = vadd.f32 %v152_v54, %v148_v61  ;;  %v150_v3 = vmax.f32 %v140_v62, 0.0 }
  0xee   :  { %v162_v4 = vadd.f32 %v161_v55, %v149_v0  ;;  %v151_v5 = vmax.f32 %v142_v1, 0.0 }
  0xef   :  { %v154_v6 = vadd.f32 %v153_v2, %v150_v3 }
  0xf0   :  { %v163_v7 = vadd.f32 %v162_v4, %v151_v5 }
  0xf1   :  { %v155_v8 = vrot.slane %v154_v6, 4 }
  0xf2   :  { %v164_v9 = vrot.slane %v163_v7, 4 }
  0xf3   :  { %v156_v10 = vadd.f32 %v155_v8, %v154_v6 }
  0xf4   :  { %v165_v11 = vadd.f32 %v164_v9, %v163_v7  ;;  %v209_v7 = vld [vmem:[%s1005_s4] sm:$0x3] }
  0xf5   :  { %v157_v12 = vrot.slane %v156_v10, 2  ;;  %v252_v9 = vld [vmem:[%s1006_s5] sm:$0x3] }
  0xf6   :  { %v166_v13 = vrot.slane %v165_v11, 2 }
  0xf7   :  { %v158_v14 = vadd.f32 %v157_v12, %v156_v10  ;;  %v257_v12 = vrot.slane %v252_v9, %v950_v37 }
  0xf8   :  { %v167_v15 = vadd.f32 %v166_v13, %v165_v11  ;;  %v261_v13 = vrot.slane %v252_v9, %v956_v39 }
  0xf9   :  { %v159_v16 = vrot.slane %v158_v14, 1 }
  0xfa   :  { %v168_v17 = vrot.slane %v167_v15, 1 }
  0xfb   :  { %v160_v18 = vadd.f32 %v159_v16, %v158_v14 }
  0xfc   :  { %v169_v19 = vadd.f32 %v168_v17, %v167_v15 }
  0xfd   :  { %v171_v20 = vmul.f32 0.03125, %v160_v18 }
  0xfe   :  { %v172_v21 = vmul.f32 0.03125, %v169_v19 }
  0xff   :  { %v173_v22 = vsub.f32 %v144_v50, %v171_v20  ;;  %v175_v23 = vsub.f32 %v146_v51, %v171_v20  ;;  %v177_v24 = vsub.f32 %v148_v61, %v171_v20  ;;  %v179_v25 = vsub.f32 %v150_v3, %v171_v20 }
 0x100   :  { %v174_v26 = vsub.f32 %v145_v52, %v172_v21  ;;  %v176_v27 = vsub.f32 %v147_v53, %v172_v21  ;;  %v178_v28 = vsub.f32 %v149_v0, %v172_v21  ;;  %v180_v29 = vsub.f32 %v151_v5, %v172_v21 }
 0x101   :  { %v181_v30 = vmul.f32 %v173_v22, %v173_v22  ;;  %v183_v31 = vmul.f32 %v175_v23, %v175_v23  ;;  %v185_v34 = vmul.f32 %v177_v24, %v177_v24  ;;  %v187_v41 = vmul.f32 %v179_v25, %v179_v25 }
 0x102   :  { %v182_v32 = vmul.f32 %v174_v26, %v174_v26  ;;  %v184_v33 = vmul.f32 %v176_v27, %v176_v27  ;;  %v186_v38 = vmul.f32 %v178_v28, %v178_v28  ;;  %v188_v43 = vmul.f32 %v180_v29, %v180_v29 }
 0x103   :  { %v189_v35 = vadd.f32 %v183_v31, %v181_v30  ;;  %v218_v0 = vunpack.c.l.s4 %v792_v63 }
 0x104   :  { %v198_v40 = vadd.f32 %v184_v33, %v182_v32 }
 0x105   :  { %v190_v42 = vadd.f32 %v189_v35, %v185_v34  ;;  %v219_v1 = vunpack.c.0.s8 %v218_v0 }
 0x106   :  { %v199_v44 = vadd.f32 %v198_v40, %v186_v38 }
 0x107   :  { %v191_v45 = vadd.f32 %v190_v42, %v187_v41  ;;  %v222_v3 = vsub.s32 %v219_v1, %v947_v36 }
 0x108   :  { %v200_v46 = vadd.f32 %v199_v44, %v188_v43 }
 0x109   :  { %v192_v47 = vrot.slane %v191_v45, 4 }
 0x10a   :  { %v201_v48 = vrot.slane %v200_v46, 4 }
 0x10b   :  { %v193_v49 = vadd.f32 %v192_v47, %v191_v45 }
 0x10c   :  { %v202_v50 = vadd.f32 %v201_v48, %v200_v46 }
 0x10d   :  { %v194_v51 = vrot.slane %v193_v49, 2 }
 0x10e   :  { %v203_v52 = vrot.slane %v202_v50, 2 }
 0x10f   :  { %v195_v53 = vadd.f32 %v194_v51, %v193_v49  ;;  %v309_v49 = vld [vmem:[%s1008_s7] sm:$0xf] }
 0x110   :  { %v204_v54 = vadd.f32 %v203_v52, %v202_v50  ;;  %v490_v51 = vrot.slane %v309_v49, %v950_v37 }
 0x111   :  { %v196_v55 = vrot.slane %v195_v53, 1 }
 0x112   :  { %v205_v56 = vrot.slane %v204_v54, 1 }
 0x113   :  { %v197_v57 = vadd.f32 %v196_v55, %v195_v53  ;;  %v573_v55 = vsub.s32 3, %v947_v36 }
 0x114   :  { %v206_v58 = vadd.f32 %v205_v56, %v204_v54  ;;  %v545_v54 = vsub.s32 2, %v947_v36  ;;  %v661_v56 = vld [vmem:[%s1009_s8] ss:$0 sm:$0xff] }
 0x115   :  { %v207_v59 = vmul.f32 0.03125, %v197_v57 }
 0x116   :  { %v208_v60 = vmul.f32 0.03125, %v206_v58  ;;  %v518_v58 = vrot.slane %v309_v49, %v956_v39  ;;  %v546_v1 = vrot.slane %v309_v49, %v545_v54 }
 0x117   :  { %v210_v61 = vadd.f32 1e-05, %v207_v59 }
 0x118   :  { %v211_v62 = vadd.f32 1e-05, %v208_v60 }
 0x119   :  { %760 = vrsqrt.f32 %v210_v61 }
 0x11a   :  { %762 = vrsqrt.f32 %v211_v62 }
 0x123   :  { %v761_v2 = vpop.eup %760 }
 0x124   :  { %v763_v4 = vpop.eup %762 }
 0x125   :  { %v216_v5 = vcombine.low %v761_v2, %v763_v4  ;;  %v574_v2 = vrot.slane %v309_v49, %v573_v55 }
 0x127   :  { %v223_v6 = vrot.slane %v216_v5, %v222_v3 }
 0x129   :  { %v230_v8 = vrot.slane %v223_v6, %v222_v3 }
 0x12b   :  { %v232_v10 = vmul.f32 %v230_v8, %v209_v7 }
 0x12d   :  { %v241_v11 = vrot.slane %v232_v10, %v956_v39  ;;  %v237_v14 = vrot.slane %v232_v10, %v950_v37 }
 0x12f   :  { %v251_v15 = vmul.f32 %v241_v11, %v180_v29  ;;  %v245_v16 = vmul.f32 %v241_v11, %v174_v26  ;;  %v247_v17 = vmul.f32 %v241_v11, %v176_v27  ;;  %v244_v18 = vmul.f32 %v237_v14, %v173_v22 }
 0x130   :  { %v246_v19 = vmul.f32 %v237_v14, %v175_v23  ;;  %v249_v20 = vmul.f32 %v241_v11, %v178_v28  ;;  %v248_v21 = vmul.f32 %v237_v14, %v177_v24  ;;  %v250_v30 = vmul.f32 %v237_v14, %v179_v25  ;;  %v311_v23 = vld [vmem:[#allocation2] sm:$0x1]  ;;  %v501_v24 = vpop.permute.xlu1 %500  ;;  %v470_v28 = vpop.permute.xlu0 %469 }
 0x131   :  { %v265_v31 = vadd.f32 %v261_v13, %v245_v16  ;;  %v267_v32 = vadd.f32 %v261_v13, %v247_v17  ;;  %v264_v33 = vadd.f32 %v257_v12, %v244_v18  ;;  %v271_v34 = vadd.f32 %v261_v13, %v251_v15  ;;  %592 = vperm.xlu0 %737, %v311_v23  }
 0x132   :  { %v266_v35 = vadd.f32 %v257_v12, %v246_v19  ;;  %v269_v38 = vadd.f32 %v261_v13, %v249_v20  ;;  %v268_v40 = vadd.f32 %v257_v12, %v248_v21  ;;  %v270_v41 = vadd.f32 %v257_v12, %v250_v30 }
 0x133   :  { %v313_v42 = vpack.c.bf16 %v267_v32, %v265_v31  ;;  %v793_v22 = vmov 0.0   ;;  %v491_v62 = vmul.f32 %v490_v51, %v470_v28  ;;  %v519_v4 = vmul.f32 %v518_v58, %v501_v24 }
 0x134   :  { %v312_v43 = vpack.c.bf16 %v266_v35, %v264_v33  ;;  %v315_v44 = vpack.c.bf16 %v271_v34, %v269_v38  ;;  %v314_v45 = vpack.c.bf16 %v270_v41, %v268_v40  ;;  %709 = vmatprep.subr.bf16.mxu0 %v793_v22  ;;  %713 = vmatprep.mubr.msk.bf16.mxu0 %vm794_vm1, %v793_v22  ;;  %v505_v25 = vpop.permute.xlu1 %504  ;;  %v475_v46 = vpop.permute.xlu0 %474 }
 0x135   :  { %450 = vmatprep.mubr.bf16.mxu1 %v313_v42  ;;  %v492_v5 = vmul.f32 %v490_v51, %v475_v46  ;;  %v520_v8 = vmul.f32 %v518_v58, %v505_v25 }
 0x136   :  { %451 = vmatmul.mubr.bf16.vlgmr.msra.gmra.mrb[0].mxu1 %v312_v43 }
 0x137   :  { %458 = vmatprep.mubr.bf16.mxu1 %v315_v44 }
 0x138   :  { %v533_v26 = vpop.permute.xlu1 %532  ;;  %v529_v47 = vpop.permute.xlu0 %528 }
 0x139   :  { %v547_v10 = vmul.f32 %v546_v1, %v529_v47  ;;  %v548_v39 = vmul.f32 %v546_v1, %v533_v26 }
 0x13c   :  { %v557_v27 = vpop.permute.xlu1 %556  ;;  %v561_v53 = vpop.permute.xlu0 %560 }
 0x13d   :  { %v575_v14 = vmul.f32 %v574_v2, %v557_v27  ;;  %v576_v20 = vmul.f32 %v574_v2, %v561_v53 }
 0x13e   :  { %459 = vmatmul.mubr.bf16.gmra.mrb[4].mxu1 %v314_v45 }
 0x140   :  { %v480_v29 = vpop.permute.xlu1 %479  ;;  %v509_v7 = vpop.permute.xlu0 %508 }
 0x141   :  { %v493_v19 = vmul.f32 %v490_v51, %v480_v29  ;;  %v521_v31 = vmul.f32 %v518_v58, %v509_v7 }
 0x144   :  { %v485_v48 = vpop.permute.xlu1 %484  ;;  %v541_v38 = vpop.permute.xlu0 %540 }
 0x145   :  { %v494_v40 = vmul.f32 %v490_v51, %v485_v48  ;;  %v550_v23 = vmul.f32 %v546_v1, %v541_v38 }
 0x148   :  { %v513_v50 = vpop.permute.xlu1 %512 }
 0x149   :  { %v522_v44 = vmul.f32 %v518_v58, %v513_v50 }
 0x14c   :  { %v537_v3 = vpop.permute.xlu1 %536 }
 0x14d   :  { %v549_v45 = vmul.f32 %v546_v1, %v537_v3 }
 0x150   :  { %v565_v21 = vpop.permute.xlu1 %564 }
 0x151   :  { %v577_v46 = vmul.f32 %v574_v2, %v565_v21 }
 0x154   :  { %v569_v28 = vpop.permute.xlu1 %568 }
 0x155   :  { %v578_v53 = vmul.f32 %v574_v2, %v569_v28 }
 0x1b0   :  { %v593_v58 = vpop.permute.xlu0 %592 }
 0x209   :  { %v694_v52 = vpop.f32.mrb[0].mxu1 }
 0x20a   :  { %v695_v57 = vpop.f32.mrb[1].mxu1 }
 0x20b   :  { %v696_v59 = vadd.f32 %v695_v57, %v694_v52  ;;  %v697_v60 = vpop.f32.mrb[2].mxu1 }
 0x20c   :  { %v698_v61 = vpop.f32.mrb[3].mxu1 }
 0x20d   :  { %v453_v63 = vadd.f32 %v696_v59, %v661_v56  ;;  %v699_v0 = vadd.f32 %v698_v61, %v697_v60  ;;  %v598_v59 = vrot.slane %v593_v58, %v950_v37 }
 0x20f   :  { %v495_v6 = vadd.f32 %v491_v62, %v453_v63  ;;  %v456_v36 = vadd.f32 %v699_v0, %v661_v56 }
 0x211   :  { %v523_v9 = vadd.f32 %v519_v4, %v495_v6  ;;  %v496_v11 = vadd.f32 %v492_v5, %v456_v36  ;;  %v700_v12 = vpop.f32.mrb[4].mxu1 }
 0x212   :  { %v701_v13 = vpop.f32.mrb[5].mxu1 }
 0x213   :  { %v551_v15 = vadd.f32 %v547_v10, %v523_v9  ;;  %v524_v16 = vadd.f32 %v520_v8, %v496_v11  ;;  %v702_v17 = vadd.f32 %v701_v13, %v700_v12  ;;  %v703_v18 = vpop.f32.mrb[6].mxu1 }
 0x214   :  { %v704_v30 = vpop.f32.mrb[7].mxu1 }
 0x215   :  { %v579_v32 = vadd.f32 %v575_v14, %v551_v15  ;;  %v552_v33 = vadd.f32 %v548_v39, %v524_v16  ;;  %v461_v34 = vadd.f32 %v702_v17, %v661_v56  ;;  %v705_v35 = vadd.f32 %v704_v30, %v703_v18 }
 0x217   :  { %v580_v41 = vadd.f32 %v576_v20, %v552_v33  ;;  %v464_v42 = vadd.f32 %v705_v35, %v661_v56  ;;  %v497_v43 = vadd.f32 %v493_v19, %v461_v34  ;;  %v583_v24 = vmax.f32 %v579_v32, 0.0  ;;  %v310_v56 = vld [vmem:[%s1010_s9] sm:$0x1] }
 0x218   :  { %v587_v57 = vpack.c.bf16 %v310_v56, %v310_v56 }
 0x219   :  { %v584_v25 = vmax.f32 %v580_v41, 0.0  ;;  %v498_v26 = vadd.f32 %v494_v40, %v464_v42  ;;  %v525_v27 = vadd.f32 %v521_v31, %v497_v43 }
 0x21b   :  { %v588_v29 = vpack.c.bf16 %v584_v25, %v583_v24  ;;  %v553_v47 = vadd.f32 %v549_v45, %v525_v27  ;;  %v526_v49 = vadd.f32 %v522_v44, %v498_v26 }
 0x21d   :  { %v581_v52 = vadd.f32 %v577_v46, %v553_v47  ;;  %v554_v54 = vadd.f32 %v550_v23, %v526_v49  ;;  %710 = vmatpush3.bf16.xpose.msra.mxu0 %v588_v29 }
 0x21e   :  { %711 = vmatprep.subr.bf16.mxu0 %v793_v22 }
 0x21f   :  { %v582_v48 = vadd.f32 %v578_v53, %v554_v54  ;;  %v585_v51 = vmax.f32 %v581_v52, 0.0 }
 0x221   :  { %v586_v50 = vmax.f32 %v582_v48, 0.0 }
 0x223   :  { %v589_v55 = vpack.c.bf16 %v586_v50, %v585_v51 }
 0x225   :  { %712 = vmatpush3.bf16.xpose.msra.mxu0 %v589_v55 }
 0x22c   :  { %714 = vmatmul.mubr.bf16.vlgmr.msra.gmra.mrb[8].mxu0 %v587_v57 }
 0x2ff   :  { %v633_v60 = vpop.f32.mrb[8].mxu0 }
 0x300   :  { %v634_v61 = vadd.f32 %v633_v60, %v598_v59  ;;  %v715_v22 = vpop.f32.mrb[9].mxu0 }
 0x301   :  { %v636_v62 = vpop.f32.mrb[10].mxu0 }
 0x302   :  { %v716_v63 = vpop.f32.mrb[11].mxu0  ;;  %640 = vst.msk [vmem:[#allocation3] sm:$0x1] %vm639_vm2, %v634_v61 }
 0x303   :  { %775 = shalt.err (!%p772_p4)
}
 0x304   :  { %s776_s0 = scalar_lea.hbm %s1012_s11, 16 }
 0x305   :  { %p777_p5 = scmp.ne.s32.totalorder %s1012_s11, %s776_s0  ;;  %p780_p6 = scmp.lt.u32.totalorder %s776_s0, %s1012_s11 }
 0x307   :  { %p782_p7 = pnand %p780_p6, %p777_p5 }
 0x309   :  { %785 = shalt.err (!%p782_p7)
}
 0x30a   :  { %650 = dma.vmem_to_hbm [thread:$0]  %s648_s16, 16, %s1012_s11, [#allocation4]  }
 0x30b   :  { %786 = dma.done.wait [#allocation4], 16  }
 0x30c   :  { %787 = vsyncadd [#allocation4], 4294967280 }
 0x30d   :  { %654 = vsyncpa [#allocation4], 1 }

</bundles_post_ra>
